<compile_context>
chip_gen: v6e
topology: v6e:2x2x1
jax: 0.10.0
libtpu: 0.0.40
codegen_flags: <defaults>
</compile_context>

<pallas_src>
import functools

import jax
import jax.numpy as jnp
from jax.experimental import pallas as pl
from jax.experimental.pallas import tpu as pltpu


# ----------------------------------------------------------------------------
# Kernel
# ----------------------------------------------------------------------------
def dense_unit_norm_kernel(x_ref, w_ref, w2_ref, b2_ref, out_ref, *, seq_length):
    # Stage 1: fused [mean | var] matmul on the MXU, bf16 in, f32 accumulate.
    x = x_ref[...].astype(jnp.bfloat16)          # no-op if producer already feeds bf16
    y = jnp.dot(x, w_ref[...], preferred_element_type=jnp.float32)   # (TB, 2E) f32

    # Stage 2: Linear(1 -> S) is rank-1 in S.  Emit lane-dense flat (TB, S*2E):
    #   out[b, s*2E + c] = y[b, c] * w2[s, c] + b2'[s, c]
    # (stage-1 bias already folded into b2').  jnp.tile lane-repeats y S times.
    y_rep = jnp.tile(y, (1, seq_length))                              # (TB, S*2E) f32
    out_ref[...] = (y_rep * w2_ref[...] + b2_ref[...]).astype(out_ref.dtype)


# ----------------------------------------------------------------------------
# Wrapper
# ----------------------------------------------------------------------------
def _round_up(n, m):
    return ((n + m - 1) // m) * m


def _vmem_capacity_bytes():
    try:
        return int(pltpu.get_tpu_info().vmem_capacity_bytes)
    except Exception:
        return 64 * 1024 * 1024   # conservative fallback (v7x per-TC VMEM)


def _pick_batch_tile(batch, features, lane_out, out_itemsize,
                     resident_bytes, budget_bytes, align):
    """Largest batch tile (multiple of `align`) whose double-buffered x/out
    tiles fit the VMEM budget after subtracting the resident-param bytes,
    while keeping >= 2 grid steps whenever the batch allows (megacore)."""
    per_row = 2 * features * 4 + 2 * lane_out * out_itemsize   # x f32 + out, 2 bufs
    avail = max(budget_bytes - resident_bytes, 1 << 20)
    tb = max(align, (avail // max(per_row, 1)) // align * align)
    b_full = _round_up(batch, align)
    tb = min(tb, b_full)                         # never over-pad small batches
    if b_full >= 2 * align and tb > b_full // 2:
        tb = _round_up(max(b_full // 2, align), align)   # force >= 2 grid steps
    return tb


def dense_unit_norm(x, params, *, out_dtype=jnp.bfloat16):
    # Pass out_dtype=jnp.float32 if strict f32 parity of the stored slab is needed.
    B, F = x.shape
    E = int(params["embedding_dim"])
    S = int(params["seq_length"])
    two_e = 2 * E
    lane_out = S * two_e

    out_itemsize = jnp.dtype(out_dtype).itemsize
    align = 16 if out_itemsize < 4 else 8        # native sublane tile for the out dtype

    # Generation-aware VMEM budget (v5e/v6e: 128 MiB, v7x: 64 MiB per TC).
    cap = _vmem_capacity_bytes()
    vmem_limit = int(cap * 0.7)
    resident = 2 * (F * two_e * 2 + 2 * lane_out * 4)    # stage-1 W (bf16) + stage-2 params,
                                                         # counted double-buffered
    TB = _pick_batch_tile(B, F, lane_out, out_itemsize,
                          resident, int(vmem_limit * 0.8), align)

    B_pad = _round_up(B, TB)
    if B_pad != B:
        x = jnp.pad(x, ((0, B_pad - B), (0, 0)))
    grid = (B_pad // TB,)

    cost = pl.CostEstimate(
        flops=2 * B_pad * F * two_e + 2 * B_pad * lane_out,
        transcendentals=0,
        bytes_accessed=(B_pad * F * x.dtype.itemsize      # x
                        + F * two_e * 2                   # fused bf16 weight
                        + 2 * lane_out * 4                # stage-2 weight + folded bias
                        + B_pad * lane_out * out_itemsize),  # output slab
    )

    out = pl.pallas_call(
        functools.partial(dense_unit_norm_kernel, seq_length=S),
        out_shape=jax.ShapeDtypeStruct((B_pad, lane_out), out_dtype),
        grid_spec=pltpu.PrefetchScalarGridSpec(
            num_scalar_prefetch=0,
            grid=grid,
            in_specs=[
                pl.BlockSpec((TB, F), lambda i: (i, 0)),        # x tile
                pl.BlockSpec((F, two_e), lambda i: (0, 0)),     # fused stage-1 W (resident)
                pl.BlockSpec((1, lane_out), lambda i: (0, 0)),  # stage-2 weight (flat)
                pl.BlockSpec((1, lane_out), lambda i: (0, 0)),  # folded bias (flat)
            ],
            out_specs=pl.BlockSpec((TB, lane_out), lambda i: (i, 0)),
        ),
        compiler_params=pltpu.CompilerParams(
            dimension_semantics=("parallel",),   # shard batch grid over v7x's 2 TCs
            vmem_limit_bytes=vmem_limit,
        ),
        cost_estimate=cost,
    )(x, params["w_cat"], params["w2_flat"], params["b2_flat"])

    # Layout plumbing back to the PyTorch (B, E, S) convention.
    # NOTE: this swapaxes is a separate XLA pass over the slab; if the consumer
    # accepts the lane-dense (B, S, 2E) layout, return out[:B].reshape(B,S,2E) instead.
    out = out[:B].reshape(B, S, two_e)
    mean = jnp.swapaxes(out[:, :, :E], 1, 2)         # (B, E, S)
    var = jnp.swapaxes(out[:, :, E:], 1, 2)          # (B, E, S)
    return mean, var


# ----------------------------------------------------------------------------
# Parameter init (mimics PyTorch nn.Linear defaults) + packing for the kernel
# ----------------------------------------------------------------------------
def init_params(key, features, embedding_dim, seq_length):
    ks = jax.random.split(key, 8)

    def linear_init(kw, kb, fan_in, fan_out):
        bound = 1.0 / jnp.sqrt(jnp.float32(fan_in))
        w = jax.random.uniform(kw, (fan_out, fan_in), jnp.float32, -bound, bound)
        b = jax.random.uniform(kb, (fan_out,), jnp.float32, -bound, bound)
        return w, b

    wm, bm = linear_init(ks[0], ks[1], features, embedding_dim)
    w2m, b2m = linear_init(ks[2], ks[3], 1, seq_length)
    wv, bv = linear_init(ks[4], ks[5], features, embedding_dim)
    w2v, b2v = linear_init(ks[6], ks[7], 1, seq_length)

    # spectral_norm on the (S, 1) weights: exact (rank-1 => sigma == ||w||_2).
    # TODO(synk): if these weights are trained, re-normalize w2/||w2|| per step
    # outside the kernel (PyTorch re-estimates sigma every forward).
    w2m_sn = (w2m / jnp.linalg.norm(w2m)).reshape(-1)   # (S,)
    w2v_sn = (w2v / jnp.linalg.norm(w2v)).reshape(-1)   # (S,)

    E, S = embedding_dim, seq_length

    # Fused stage-1 weight: [mean | var] along the output dim, bf16 for the MXU.
    w_cat = jnp.concatenate([wm.T, wv.T], axis=1).astype(jnp.bfloat16)   # (F, 2E)
    b_cat = jnp.concatenate([bm, bv], axis=0)                            # (2E,)

    # Stage-2 params in the lane-dense flat layout (1, S*2E), with the stage-1
    # bias folded in:  (y + b)*w2 + b2  ==  y*w2 + (b*w2 + b2).
    w2_rows = jnp.concatenate([jnp.tile(w2m_sn[:, None], (1, E)),
                               jnp.tile(w2v_sn[:, None], (1, E))], axis=1)   # (S, 2E)
    b2_rows = jnp.concatenate([jnp.tile(b2m[:, None], (1, E)),
                               jnp.tile(b2v[:, None], (1, E))], axis=1)      # (S, 2E)
    b2_fold = b_cat[None, :] * w2_rows + b2_rows                             # (S, 2E)

    packed = dict(w_cat=w_cat,
                  w2_flat=w2_rows.reshape(1, S * 2 * E),
                  b2_flat=b2_fold.reshape(1, S * 2 * E),
                  embedding_dim=E, seq_length=S)
    # Unfused f32 params, only for the pure-f32 reference check.
    ref = dict(wm=wm.T, bm=bm.reshape(1, -1), wv=wv.T, bv=bv.reshape(1, -1),
               w2m=w2m_sn, b2m=b2m, w2v=w2v_sn, b2v=b2v)
    return packed, ref


# ----------------------------------------------------------------------------
# References
# ----------------------------------------------------------------------------
def reference_matched(x, p, out_dtype=jnp.bfloat16):
    """Same math as the kernel (bf16 x/W, f32 accumulation, out_dtype store)."""
    E, S = p["embedding_dim"], p["seq_length"]
    xb = x.astype(jnp.bfloat16).astype(jnp.float32)
    w = p["w_cat"].astype(jnp.float32)
    y = jnp.dot(xb, w, preferred_element_type=jnp.float32)
    out = (jnp.tile(y, (1, S)) * p["w2_flat"] + p["b2_flat"]).astype(out_dtype)
    out = out.reshape(x.shape[0], S, 2 * E)
    mean = jnp.swapaxes(out[:, :, :E], 1, 2)
    var = jnp.swapaxes(out[:, :, E:], 1, 2)
    return mean, var


def reference_f32(x, rp):
    """Pure f32 PyTorch-module semantics."""
    mean = x @ rp["wm"] + rp["bm"]
    var = x @ rp["wv"] + rp["bv"]
    mean = mean[:, :, None] * rp["w2m"].reshape(1, 1, -1) + rp["b2m"].reshape(1, 1, -1)
    var = var[:, :, None] * rp["w2v"].reshape(1, 1, -1) + rp["b2v"].reshape(1, 1, -1)
    return mean, var


# ----------------------------------------------------------------------------
# Test
# ----------------------------------------------------------------------------
if __name__ == "__main__":
    B, F, E, S = 2, 32, 32, 8   # batch, features, embedding_dim, seq_length

    key = jax.random.PRNGKey(0)
    kx, kp = jax.random.split(key)
    x = jax.random.normal(kx, (B, F), jnp.float32)
    params, ref_params = init_params(kp, F, E, S)

    mean_out, var_out = dense_unit_norm(x, params)
    jax.block_until_ready((mean_out, var_out))

    assert mean_out.shape == (B, E, S) and var_out.shape == (B, E, S)

    # Tight check vs a reference that applies the kernel's bf16 roundings.
    m_bf, v_bf = reference_matched(x, params)
    assert jnp.allclose(mean_out.astype(jnp.float32), m_bf.astype(jnp.float32),
                        atol=1e-2, rtol=1e-2)
    assert jnp.allclose(var_out.astype(jnp.float32), v_bf.astype(jnp.float32),
                        atol=1e-2, rtol=1e-2)

    # Loose check vs the pure-f32 PyTorch semantics (bf16 matmul + bf16 store).
    m_f32, v_f32 = reference_f32(x, ref_params)
    assert jnp.allclose(mean_out.astype(jnp.float32), m_f32, atol=8e-2, rtol=8e-2)
    assert jnp.allclose(var_out.astype(jnp.float32), v_f32, atol=8e-2, rtol=8e-2)

    print("KERNEL_OK")
</pallas_src>

<mosaic_0001>
module attributes {stable_mosaic.version = 11 : i64} {
  func.func @dense_unit_norm_kernel(%arg0: i32, %arg1: memref<16x32xf32, #tpu.memory_space<vmem>>, %arg2: memref<32x64xbf16, #tpu.memory_space<vmem>>, %arg3: memref<1x512xf32, #tpu.memory_space<vmem>>, %arg4: memref<1x512xf32, #tpu.memory_space<vmem>>, %arg5: memref<16x512xbf16, #tpu.memory_space<vmem>>) attributes {dimension_semantics = [#tpu.dimension_semantics<parallel>], iteration_bounds = array<i64: 1>, scalar_prefetch = 0 : i64, scratch_operands = 0 : i64, tpu.core_type = #tpu.core_type<tc>, window_params = [{transform_indices = @transform_0, window_bounds = array<i64: 16, 32>}, {pipeline_mode = #tpu.pipeline_mode<synchronous>, transform_indices = @transform_1, window_bounds = array<i64: 32, 64>}, {pipeline_mode = #tpu.pipeline_mode<synchronous>, transform_indices = @transform_2, window_bounds = array<i64: 1, 512>}, {pipeline_mode = #tpu.pipeline_mode<synchronous>, transform_indices = @transform_3, window_bounds = array<i64: 1, 512>}, {transform_indices = @transform_4, window_bounds = array<i64: 16, 512>}]} {
    %c0 = arith.constant 0 : index
    %c0_0 = arith.constant 0 : index
    %0 = vector.load %arg1[%c0, %c0_0] : memref<16x32xf32, #tpu.memory_space<vmem>>, vector<16x32xf32>
    %1 = arith.truncf %0 : vector<16x32xf32> to vector<16x32xbf16>
    %c0_1 = arith.constant 0 : index
    %c0_2 = arith.constant 0 : index
    %2 = vector.load %arg2[%c0_1, %c0_2] : memref<32x64xbf16, #tpu.memory_space<vmem>>, vector<32x64xbf16>
    %cst = arith.constant dense<0.000000e+00> : vector<16x64xf32>
    %3 = tpu.matmul %1, %2, %cst {dimension_numbers = #tpu.dot_dimension_numbers<[1], [0], [0], [1], [0, 0, 1, 1], [], []>} : vector<16x32xbf16>, vector<32x64xbf16>, vector<16x64xf32> -> vector<16x64xf32>
    %4 = tpu.concatenate %3, %3, %3, %3, %3, %3, %3, %3 in 1 : vector<16x64xf32>, vector<16x64xf32>, vector<16x64xf32>, vector<16x64xf32>, vector<16x64xf32>, vector<16x64xf32>, vector<16x64xf32>, vector<16x64xf32> -> vector<16x512xf32>
    %c0_3 = arith.constant 0 : index
    %c0_4 = arith.constant 0 : index
    %5 = vector.load %arg3[%c0_3, %c0_4] : memref<1x512xf32, #tpu.memory_space<vmem>>, vector<1x512xf32>
    %6 = vector.broadcast %5 : vector<1x512xf32> to vector<16x512xf32>
    %7 = arith.mulf %4, %6 : vector<16x512xf32>
    %c0_5 = arith.constant 0 : index
    %c0_6 = arith.constant 0 : index
    %8 = vector.load %arg4[%c0_5, %c0_6] : memref<1x512xf32, #tpu.memory_space<vmem>>, vector<1x512xf32>
    %9 = vector.broadcast %8 : vector<1x512xf32> to vector<16x512xf32>
    %10 = arith.addf %7, %9 : vector<16x512xf32>
    %11 = arith.truncf %10 : vector<16x512xf32> to vector<16x512xbf16>
    %c0_7 = arith.constant 0 : index
    %c0_8 = arith.constant 0 : index
    %12 = vector.load %arg5[%c0_7, %c0_8] : memref<16x512xbf16, #tpu.memory_space<vmem>>, vector<16x512xbf16>
    tpu.vector_store %arg5[%c0_7, %c0_8], %11 {strides = array<i32>} : memref<16x512xbf16, #tpu.memory_space<vmem>>, vector<16x512xbf16>,
    return
  }
  func.func @transform_0(%arg0: i32) -> (i32, i32) {
    %c0_i32 = arith.constant 0 : i32
    %c0_i32_0 = arith.constant 0 : i32
    return %arg0, %c0_i32 : i32, i32
  }
  func.func @transform_1(%arg0: i32) -> (i32, i32) {
    %c0_i32 = arith.constant 0 : i32
    %c0_i32_0 = arith.constant 0 : i32
    %c0_i32_1 = arith.constant 0 : i32
    return %c0_i32, %c0_i32_0 : i32, i32
  }
  func.func @transform_2(%arg0: i32) -> (i32, i32) {
    %c0_i32 = arith.constant 0 : i32
    %c0_i32_0 = arith.constant 0 : i32
    %c0_i32_1 = arith.constant 0 : i32
    return %c0_i32, %c0_i32_0 : i32, i32
  }
  func.func @transform_3(%arg0: i32) -> (i32, i32) {
    %c0_i32 = arith.constant 0 : i32
    %c0_i32_0 = arith.constant 0 : i32
    %c0_i32_1 = arith.constant 0 : i32
    return %c0_i32, %c0_i32_0 : i32, i32
  }
  func.func @transform_4(%arg0: i32) -> (i32, i32) {
    %c0_i32 = arith.constant 0 : i32
    %c0_i32_0 = arith.constant 0 : i32
    return %arg0, %c0_i32 : i32, i32
  }
}

</mosaic_0001>

<bundles_post_ra>
// kernel: tpu_custom_call.1
= control target key start
LH: loop header
LB: loop body
LE: loop exit
PB: predicated region body
PF: predicated region fallthrough
CT: control target
= control target key end

     0   :  { %9 = vsyncpa [#allocation3], 0  ;;  %s419_s0 = inlined_call_operand.hbm [shape: f32[16,32], index: 0, kind: input, shape index: {}]   ;;  %s420_s1 = inlined_call_operand.hbm [shape: bf16[32,64], index: 1, kind: input, shape index: {}]   ;;  %s421_s2 = inlined_call_operand.hbm [shape: f32[1,512], index: 2, kind: input, shape index: {}]   ;;  %s422_s3 = inlined_call_operand.vmem [shape: f32[1,512], index: 3, kind: input, shape index: {}]   ;;  %s423_s4 = inlined_call_operand.hbm [shape: bf16[16,512], index: 4, kind: output, shape index: {}]  }
   0x1   :  { %10 = vsyncpa [#allocation6], 0 }
   0x2   :  { %11 = vsyncpa [#allocation4], 0  ;;  %s361_s15 = smov [#allocation5]  }
   0x3   :  { %s29_s16 = sshll.u32 %s361_s15, 4  ;;  %s30_s16 = int_to_ptr.vmem [resolvable:$true] %s29_s16 }
   0x4   :  { %s283_s17 = scalar_lea.vmem %s30_s16, 256  ;;  %p288_p1 = scmp.lt.s32.totalorder %s30_s16, %s30_s16 }
   0x5   :  { %p284_p0 = scmp.ne.s32.totalorder %s30_s16, %s283_s17  ;;  %p289_p2 = scmp.lt.s32.totalorder %s283_s17, %s283_s17 }
   0x7   :  { %p290_p3 = por %p289_p2, %p288_p1 }
   0x9   :  { %p291_p4 = pnand %p290_p3, %p284_p0 }
   0xb   :  { %294 = shalt.err (!%p291_p4)
}
   0xc   :  { %s362_s18 = smov 64   ;;  %s363_s19 = smov 4  }
   0xd   :  { %35 = dma.hbm_to_vmem [thread:$0]  %s420_s1, 256, %s30_s16, [#allocation6], %s362_s18, %s362_s18, %s363_s19  }
   0xe   :  { %s364_s22 = smov [#allocation2]  }
   0xf   :  { %s17_s23 = sshll.u32 %s364_s22, 4  ;;  %s18_s23 = int_to_ptr.vmem [resolvable:$true] %s17_s23 }
  0x10   :  { %s303_s24 = scalar_lea.vmem %s18_s23, 256  ;;  %p308_p6 = scmp.lt.s32.totalorder %s18_s23, %s18_s23 }
  0x11   :  { %p304_p5 = scmp.ne.s32.totalorder %s18_s23, %s303_s24  ;;  %p309_p7 = scmp.lt.s32.totalorder %s303_s24, %s303_s24 }
  0x13   :  { %p310_p8 = por %p309_p7, %p308_p6 }
  0x15   :  { %p311_p9 = pnand %p310_p8, %p304_p5 }
  0x17   :  { %314 = shalt.err (!%p311_p9)
}
  0x18   :  { %s365_s25 = smov 128   ;;  %s366_s26 = smov 8  }
  0x19   :  { %23 = dma.hbm_to_vmem [thread:$0]  %s419_s0, 256, %s18_s23, [#allocation3], %s365_s25, %s365_s25, %s366_s26  }
  0x1a   :  { %s367_s29 = smov [#allocation7]  }
  0x1b   :  { %s42_s30 = sshll.u32 %s367_s29, 4  ;;  %s43_s30 = int_to_ptr.vmem [resolvable:$true] %s42_s30 }
  0x1c   :  { %s323_s1 = scalar_lea.vmem %s43_s30, 64  ;;  %p328_p11 = scmp.lt.s32.totalorder %s43_s30, %s43_s30 }
  0x1d   :  { %p324_p10 = scmp.ne.s32.totalorder %s43_s30, %s323_s1  ;;  %p329_p12 = scmp.lt.s32.totalorder %s323_s1, %s323_s1 }
  0x1f   :  { %p330_p13 = por %p329_p12, %p328_p11 }
  0x21   :  { %p331_p0 = pnand %p330_p13, %p324_p10 }
  0x23   :  { %334 = shalt.err (!%p331_p0)
}
  0x24   :  { %45 = dma.hbm_to_vmem [thread:$0]  %s421_s2, 64, %s43_s30, [#allocation6]  }
  0x25   :  { %355 = dma.done.wait [#allocation3], 256  }
  0x26   :  { %356 = vsyncadd [#allocation3], 4294967040 }
  0x27   :  { %357 = dma.done.wait [#allocation6], 320  }
  0x28   :  { %358 = vsyncadd [#allocation6], 4294966976  ;;  %v368_v0 = vmov 0.0   ;;  %vm369_vm0 = vmmov 0   ;;  %v273_v1 = vld [vmem:[#allocation5 + $0x8] sm:$0xff]   ;;  %v274_v2 = vld [vmem:[#allocation5] sm:$0xff]   ;;  %v135_v10 = vlaneseq }
  0x29   :  { %253 = vmatprep.subr.bf16.mxu0 %v368_v0  ;;  %257 = vmatprep.mubr.msk.bf16.mxu0 %vm369_vm0, %v368_v0  ;;  %v58_v3 = vld [vmem:[#allocation2] sm:$0xff]  ;;  %v59_v4 = vld [vmem:[#allocation2 + $0x8] sm:$0xff]  ;;  %vm77_vm1 = vcmask 261120   ;;  %vm130_vm2 = vcmask 523264  }
  0x2a   :  { %254 = vmatpush3.bf16.msra.mxu0 %v273_v1  ;;  %v60_v5 = vpack.c.bf16 %v59_v4, %v58_v3  ;;  %v136_v11 = vshrl.u32 %v135_v10, 7  ;;  %v133_v16 = vld [vmem:[#allocation7] sm:$0xf] }
  0x2b   :  { %255 = vmatprep.subr.bf16.mxu0 %v368_v0  ;;  %v163_v17 = vld [vmem:[%s422_s3] sm:$0xf]  ;;  %s370_s3 = smov [#allocation8]  }
  0x2c   :  { %v137_v12 = vsub.s32 0, %v136_v11  ;;  %v141_v13 = vsub.s32 1, %v136_v11  ;;  %v145_v14 = vsub.s32 2, %v136_v11  ;;  %v149_v15 = vsub.s32 3, %v136_v11  ;;  %s226_s7 = sshll.u32 %s370_s3, 4  ;;  %s227_s7 = int_to_ptr.vmem [resolvable:$true] %s226_s7 }
  0x2d   :  { %s335_s8 = scalar_lea.vmem %s227_s7, 512  ;;  %p340_p2 = scmp.lt.s32.totalorder %s227_s7, %s227_s7 }
  0x2e   :  { %256 = vmatpush3.bf16.msra.mxu0 %v274_v2  ;;  %v138_v18 = vrot.slane %v133_v16, %v137_v12  ;;  %v142_v19 = vrot.slane %v133_v16, %v141_v13  ;;  %v146_v20 = vrot.slane %v133_v16, %v145_v14  ;;  %v150_v21 = vrot.slane %v133_v16, %v149_v15  ;;  %p336_p1 = scmp.ne.s32.totalorder %s227_s7, %s335_s8  ;;  %p341_p3 = scmp.lt.s32.totalorder %s335_s8, %s335_s8 }
  0x2f   :  { %v168_v22 = vrot.slane %v163_v17, %v137_v12  ;;  %v172_v23 = vrot.slane %v163_v17, %v141_v13  ;;  %v176_v24 = vrot.slane %v163_v17, %v145_v14  ;;  %v180_v25 = vrot.slane %v163_v17, %v149_v15 }
  0x30   :  { %p342_p4 = por %p341_p3, %p340_p2 }
  0x31   :  { %258 = vmatmul.mubr.msk.bf16.vlgmr.msra.gmra.mxu0 %vm77_vm1, %v60_v5 }
  0x32   :  { %p343_p5 = pnand %p342_p4, %p336_p1 }
  0xf1   :  { %v115_v6 = vpop.f32.mrf.mxu0 }
  0xf2   :  { %124 = vrot.lane.b32.xlu0 %v115_v6, %s362_s18 }
  0xf3   :  { %v259_v7 = vpop.f32.mrf.mxu0 }
  0xf5   :  { %v118_v8 = vpop.f32.mrf.mxu0 }
  0xf6   :  { %126 = vrot.lane.b32.xlu0 %v118_v8, %s362_s18 }
  0xf7   :  { %v260_v9 = vpop.f32.mrf.mxu0 }
 0x164   :  { %v125_v26 = vpop.permute.xlu0 %124 }
 0x165   :  { %v131_v27 = vsel %vm130_vm2, %v115_v6, %v125_v26 }
 0x166   :  { %v155_v28 = vmul.f32 %v138_v18, %v131_v27  ;;  %v156_v29 = vmul.f32 %v142_v19, %v131_v27  ;;  %v157_v30 = vmul.f32 %v146_v20, %v131_v27  ;;  %v158_v31 = vmul.f32 %v150_v21, %v131_v27 }
 0x168   :  { %v185_v32 = vadd.f32 %v168_v22, %v155_v28  ;;  %v186_v33 = vadd.f32 %v172_v23, %v156_v29  ;;  %v187_v34 = vadd.f32 %v176_v24, %v157_v30  ;;  %v188_v35 = vadd.f32 %v180_v25, %v158_v31  ;;  %v127_v36 = vpop.permute.xlu0 %126 }
 0x169   :  { %v132_v37 = vsel %vm130_vm2, %v118_v8, %v127_v36 }
 0x16a   :  { %v246_v38 = vpack.c.bf16 %v186_v33, %v185_v32  ;;  %v247_v39 = vpack.c.bf16 %v188_v35, %v187_v34  ;;  %v159_v40 = vmul.f32 %v138_v18, %v132_v37  ;;  %v160_v41 = vmul.f32 %v142_v19, %v132_v37 }
 0x16b   :  { %v161_v42 = vmul.f32 %v146_v20, %v132_v37  ;;  %v162_v43 = vmul.f32 %v150_v21, %v132_v37 }
 0x16c   :  { %217 = vst [vmem:[#allocation8] sm:$0xff] %v246_v38  ;;  %218 = vst [vmem:[#allocation8 + $0x8] sm:$0xff] %v247_v39  ;;  %v189_v44 = vadd.f32 %v168_v22, %v159_v40  ;;  %v190_v45 = vadd.f32 %v172_v23, %v160_v41 }
 0x16d   :  { %v191_v46 = vadd.f32 %v176_v24, %v161_v42  ;;  %v192_v47 = vadd.f32 %v180_v25, %v162_v43 }
 0x16e   :  { %v248_v48 = vpack.c.bf16 %v190_v45, %v189_v44 }
 0x16f   :  { %v249_v49 = vpack.c.bf16 %v192_v47, %v191_v46 }
 0x170   :  { %219 = vst [vmem:[#allocation8 + $0x10] sm:$0xff] %v248_v48 }
 0x171   :  { %220 = vst [vmem:[#allocation8 + $0x18] sm:$0xff] %v249_v49 }
 0x172   :  { %346 = shalt.err (!%p343_p5)
}
 0x173   :  { %s371_s9 = smov 256   ;;  %s372_s10 = smov 16  }
 0x174   :  { %232 = dma.vmem_to_hbm [thread:$0]  %s227_s7, 512, %s423_s4, [#allocation4], %s371_s9, %s371_s9, %s372_s10  }
 0x175   :  { %359 = dma.done.wait [#allocation4], 512  }
 0x176   :  { %360 = vsyncadd [#allocation4], 4294966784 }
 0x177   :  { %236 = vsyncpa [#allocation3], 1 }
 0x178   :  { %237 = vsyncpa [#allocation6], 1 }
 0x179   :  { %238 = vsyncpa [#allocation4], 1 }

</bundles_post_ra>
